<compile_context>
chip_gen: v5e
topology: v5e:2x2
jax: 0.10.0
libtpu: 0.0.40
codegen_flags: <defaults>
</compile_context>

<pallas_src>
import functools

import numpy as np

import jax
import jax.numpy as jnp
from jax.experimental import pallas as pl
from jax.experimental.pallas import tpu as pltpu


def _nse_kernel(ind_ref, yt_ref, yp_ref, out_ref,
                shift_ref, s_y, s_ysq, s_sqd,
                *, t_total, t_tile):
    del ind_ref  # only consumed by the index_maps
    t = pl.program_id(1)
    nt = pl.num_programs(1)

    # Cast in-kernel so sub-32-bit inputs stay narrow in HBM.
    yt = yt_ref[...].astype(jnp.float32)     # [t_tile, f_block]
    yp = yp_ref[...].astype(jnp.float32)

    @pl.when(t == 0)
    def _():
        # Per-lane shift (first row of this channel) -> numerically stable
        # single-pass variance: den = sum((y-s)^2) - (sum(y-s))^2 / T.
        shift_ref[...] = yt[0:1, :]
        s_y[...] = jnp.zeros_like(s_y)
        s_ysq[...] = jnp.zeros_like(s_ysq)
        s_sqd[...] = jnp.zeros_like(s_sqd)

    def _accumulate(masked):
        yts = yt - shift_ref[...]
        diff = yt - yp
        if masked:
            # OOB region of a ragged last tile is stale VMEM; zero it before it
            # touches the accumulators.
            row = jax.lax.broadcasted_iota(jnp.int32, (t_tile, 1), 0)
            valid = (t * t_tile + row) < t_total
            yts = jnp.where(valid, yts, jnp.float32(0.0))
            diff = jnp.where(valid, diff, jnp.float32(0.0))
        s_y[...] += jnp.sum(yts, axis=0, keepdims=True)
        s_ysq[...] += jnp.sum(yts * yts, axis=0, keepdims=True)
        s_sqd[...] += jnp.sum(diff * diff, axis=0, keepdims=True)

    if t_total % t_tile != 0:
        # Ragged: mask only on the LAST tile; full tiles stay unmasked.
        @pl.when(t < nt - 1)
        def _():
            _accumulate(False)

        @pl.when(t == nt - 1)
        def _():
            _accumulate(True)
    else:
        _accumulate(False)

    @pl.when(t == nt - 1)
    def _():
        sy = s_y[...]
        den = jnp.maximum(
            s_ysq[...] - sy * (sy * jnp.float32(1.0 / t_total)),
            jnp.float32(0.0))
        # NOTE: 1e-80 underflows to 0.0 in float32, matching PyTorch float32
        # behavior (the where() only catches exactly-zero den).
        eps = jnp.float32(1e-80)
        den = jnp.where(den < eps, eps, den)
        out_ref[0] = s_sqd[...] / den        # per-lane ratio num/den


def _vmem_params():
    """Generation-aware (tile VMEM budget, scoped vmem limit)."""
    try:
        cap = int(pltpu.get_tpu_info().vmem_capacity_bytes)
    except Exception:
        cap = 64 * 1024 * 1024
    if cap >= 128 * 1024 * 1024:                       # v5e / v6e
        return 40 * 1024 * 1024, 64 * 1024 * 1024
    return 8 * 1024 * 1024, 32 * 1024 * 1024           # v7x-safe (64 MiB / TC)


def _pick_t_tile(T, f_block, itemsizes, budget):
    gran = 8 * max(1, 4 // min(itemsizes))             # 8 f32 / 16 bf16 / 32 i8
    per_row = 2 * f_block * sum(itemsizes)             # 2 pipeline bufs / input
    max_rows = max(gran, budget // max(per_row, 1))
    if T <= max_rows:
        return T
    t = max(gran, min((max_rows // gran) * gran, 4096))
    return min(t, T)


def nse_loss(y_pred, y_true, ind, *, t_tile=None,
             vmem_budget_bytes=None, vmem_limit_bytes=None):
    """y_pred, y_true: [T, C, ...spatial]; ind: channel indices along dim 1."""
    assert y_pred.shape == y_true.shape and y_pred.ndim >= 2
    T, C = int(y_true.shape[0]), int(y_true.shape[1])
    F = int(np.prod(y_true.shape[2:])) if y_true.ndim > 2 else 1

    ind_arr = jnp.asarray(ind, dtype=jnp.int32).reshape(-1)
    K = int(ind_arr.shape[0])

    # Concretize ind (usually a static index set) for layout decisions and a
    # cheap bounds check; fall back gracefully if it is traced.
    try:
        ind_np = np.asarray(ind).astype(np.int32).reshape(-1)
    except Exception:
        ind_np = None
    if ind_np is not None and K > 0:
        assert 0 <= int(ind_np.min()) and int(ind_np.max()) < C, \
            "channel index out of range"

    is_identity = (ind_np is not None and K == C
                   and bool(np.all(ind_np == np.arange(C, dtype=np.int32))))
    lane_aligned = (F % 128 == 0)

    if is_identity:
        mode = "slab"      # all channels -> one contiguous full-width block
    elif lane_aligned:
        mode = "gather"    # fused per-channel gather via scalar prefetch
    else:
        # TODO(synk): for K << C a one-time pad of F to a multiple of 128 (then
        # the fused per-channel gather) would cut HBM traffic further.
        mode = "full"      # contiguous full-width reads; select lanes in JAX

    yt2 = y_true.reshape(T, C * F)     # free reshape, no HBM copy
    yp2 = y_pred.reshape(T, C * F)

    if mode == "gather":
        f_block, n_sel, ind_blk = F, K, ind_arr
    else:
        f_block, n_sel, ind_blk = C * F, 1, jnp.zeros((1,), jnp.int32)

    budget, limit = _vmem_params()
    if vmem_budget_bytes is not None:
        budget = vmem_budget_bytes
    if vmem_limit_bytes is not None:
        limit = vmem_limit_bytes

    itemsizes = (jnp.dtype(y_true.dtype).itemsize,
                 jnp.dtype(y_pred.dtype).itemsize)
    if t_tile is None:
        t_tile = _pick_t_tile(T, f_block, itemsizes, budget)
    t_tile = int(min(t_tile, T))
    n_t = pl.cdiv(T, t_tile)

    kernel = functools.partial(_nse_kernel, t_total=T, t_tile=t_tile)

    # TODO(synk): when n_sel == 1 a leading size-2 "parallel" T split (with
    # per-half partials combined in the wrapper) would let v7x use both TCs.
    ratios = pl.pallas_call(
        kernel,
        out_shape=jax.ShapeDtypeStruct((n_sel, 1, f_block), jnp.float32),
        grid_spec=pltpu.PrefetchScalarGridSpec(
            num_scalar_prefetch=1,
            grid=(n_sel, n_t),                     # reduction (T) axis innermost
            in_specs=[
                pl.BlockSpec((t_tile, f_block),
                             lambda k, t, ind_ref: (t, ind_ref[k])),
                pl.BlockSpec((t_tile, f_block),
                             lambda k, t, ind_ref: (t, ind_ref[k])),
            ],
            out_specs=pl.BlockSpec((1, 1, f_block),
                                   lambda k, t, ind_ref: (k, 0, 0)),
            scratch_shapes=[
                pltpu.VMEM((1, f_block), jnp.float32),   # per-lane shift
                pltpu.VMEM((1, f_block), jnp.float32),   # sum (y - shift)
                pltpu.VMEM((1, f_block), jnp.float32),   # sum (y - shift)^2
                pltpu.VMEM((1, f_block), jnp.float32),   # sum (y - yp)^2
            ],
        ),
        compiler_params=pltpu.CompilerParams(
            dimension_semantics=("parallel", "arbitrary"),
            vmem_limit_bytes=limit,
        ),
    )(ind_blk, yt2, yp2)

    ratios = ratios[:, 0, :]                         # (n_sel, f_block)
    if mode == "full":
        ratios = ratios.reshape(C, F)[ind_arr]       # select the ind channels
    # loss = 1 - mean(1 - num/den) == mean(num/den)
    return jnp.mean(ratios)


def _nse_loss_ref(y_pred, y_true, ind):
    yp = y_pred[:, ind, ...].astype(jnp.float32)
    yt = y_true[:, ind, ...].astype(jnp.float32)
    y_mean = jnp.mean(yt, axis=0)
    num = jnp.sum((yt - yp) ** 2, axis=0)
    den = jnp.sum((yt - y_mean) ** 2, axis=0)
    eps = jnp.float32(1e-80)
    den = jnp.where(den < eps, eps, den)
    nse = 1.0 - num / den
    return 1.0 - jnp.mean(nse)


if __name__ == "__main__":
    key = jax.random.PRNGKey(0)

    def check(y_pred, y_true, ind, name, **kw):
        loss = nse_loss(y_pred, y_true, ind, **kw)
        jax.block_until_ready(loss)
        ref = _nse_loss_ref(y_pred, y_true, ind)
        assert jnp.allclose(loss, ref, rtol=1e-4, atol=1e-5), (name, loss, ref)

    # Test 1: fused per-channel gather (F lane-aligned), single T tile,
    #         large per-channel offset to exercise the variance-shift path.
    k1, k2, key = jax.random.split(key, 3)
    T, C, F = 16, 6, 128
    y_true = 100.0 + jax.random.normal(k1, (T, C, F), dtype=jnp.float32)
    y_pred = y_true + 0.1 * jax.random.normal(k2, (T, C, F), dtype=jnp.float32)
    check(y_pred, y_true, jnp.array([0, 2, 3], dtype=jnp.int32), "gather")

    # Test 2: fused gather, multiple T tiles incl. a ragged last tile (24=16+8).
    k1, k2, key = jax.random.split(key, 3)
    yt2 = jax.random.normal(k1, (24, 4, 128), dtype=jnp.float32)
    yp2 = yt2 + 0.3 * jax.random.normal(k2, (24, 4, 128), dtype=jnp.float32)
    check(yp2, yt2, jnp.array([1, 3], dtype=jnp.int32), "gather-ragged",
          t_tile=16)

    # Test 3: F not lane-aligned -> contiguous full-width reads, lane-select in
    #         the wrapper (no gathered HBM copy).
    k1, k2, key = jax.random.split(key, 3)
    yt3 = jax.random.normal(k1, (16, 3, 32), dtype=jnp.float32)
    yp3 = yt3 + 0.2 * jax.random.normal(k2, (16, 3, 32), dtype=jnp.float32)
    check(yp3, yt3, jnp.array([0, 2], dtype=jnp.int32), "full-width")

    # Test 4: identity ind -> single contiguous slab; bf16 inputs (dtype-aware
    #         sublane granularity) with trailing spatial dims flattened.
    k1, k2, key = jax.random.split(key, 3)
    yt4 = jax.random.normal(k1, (32, 4, 8, 16), dtype=jnp.float32
                            ).astype(jnp.bfloat16)
    yp4 = (yt4.astype(jnp.float32)
           + 0.25 * jax.random.normal(k2, (32, 4, 8, 16), dtype=jnp.float32)
           ).astype(jnp.bfloat16)
    check(yp4, yt4, jnp.arange(4, dtype=jnp.int32), "identity-slab-bf16")

    print("KERNEL_OK")
</pallas_src>

<mosaic_0001>
module attributes {stable_mosaic.version = 11 : i64} {
  func.func @_nse_kernel(%arg0: i32, %arg1: i32, %arg2: memref<3xi32, #tpu.memory_space<smem>>, %arg3: memref<16x128xf32, #tpu.memory_space<vmem>>, %arg4: memref<16x128xf32, #tpu.memory_space<vmem>>, %arg5: memref<1x1x128xf32, #tpu.memory_space<vmem>>, %arg6: memref<1x128xf32, #tpu.memory_space<vmem>>, %arg7: memref<1x128xf32, #tpu.memory_space<vmem>>, %arg8: memref<1x128xf32, #tpu.memory_space<vmem>>, %arg9: memref<1x128xf32, #tpu.memory_space<vmem>>) attributes {dimension_semantics = [#tpu.dimension_semantics<parallel>, #tpu.dimension_semantics<arbitrary>], iteration_bounds = array<i64: 3, 1>, scalar_prefetch = 1 : i64, scratch_operands = 4 : i64, tpu.core_type = #tpu.core_type<tc>, window_params = [{transform_indices = @transform_0, window_bounds = array<i64: 16, 128>}, {transform_indices = @transform_1, window_bounds = array<i64: 16, 128>}, {transform_indices = @transform_2, window_bounds = array<i64: 1, 1, 128>}]} {
    %c0 = arith.constant 0 : index
    %c0_0 = arith.constant 0 : index
    %0 = vector.load %arg3[%c0, %c0_0] : memref<16x128xf32, #tpu.memory_space<vmem>>, vector<16x128xf32>
    %c0_1 = arith.constant 0 : index
    %c0_2 = arith.constant 0 : index
    %1 = vector.load %arg4[%c0_1, %c0_2] : memref<16x128xf32, #tpu.memory_space<vmem>>, vector<16x128xf32>
    %c0_i32 = arith.constant 0 : i32
    %2 = arith.cmpi eq, %arg1, %c0_i32 : i32
    %3 = arith.extui %2 : i1 to i32
    %c0_i32_3 = arith.constant 0 : i32
    %4 = arith.cmpi ne, %3, %c0_i32_3 : i32
    scf.if %4 {
      %29 = vector.extract_strided_slice %0 {offsets = [0, 0], sizes = [1, 128], strides = [1, 1]} : vector<16x128xf32> to vector<1x128xf32>
      %c0_22 = arith.constant 0 : index
      %c0_23 = arith.constant 0 : index
      %30 = vector.load %arg6[%c0_22, %c0_23] : memref<1x128xf32, #tpu.memory_space<vmem>>, vector<1x128xf32>
      tpu.vector_store %arg6[%c0_22, %c0_23], %29 {strides = array<i32>} : memref<1x128xf32, #tpu.memory_space<vmem>>, vector<1x128xf32>,
      %cst_24 = arith.constant 0.000000e+00 : f32
      %31 = vector.broadcast %cst_24 : f32 to vector<1x128xf32>
      %c0_25 = arith.constant 0 : index
      %c0_26 = arith.constant 0 : index
      %32 = vector.load %arg7[%c0_25, %c0_26] : memref<1x128xf32, #tpu.memory_space<vmem>>, vector<1x128xf32>
      tpu.vector_store %arg7[%c0_25, %c0_26], %31 {strides = array<i32>} : memref<1x128xf32, #tpu.memory_space<vmem>>, vector<1x128xf32>,
      %cst_27 = arith.constant 0.000000e+00 : f32
      %33 = vector.broadcast %cst_27 : f32 to vector<1x128xf32>
      %c0_28 = arith.constant 0 : index
      %c0_29 = arith.constant 0 : index
      %34 = vector.load %arg8[%c0_28, %c0_29] : memref<1x128xf32, #tpu.memory_space<vmem>>, vector<1x128xf32>
      tpu.vector_store %arg8[%c0_28, %c0_29], %33 {strides = array<i32>} : memref<1x128xf32, #tpu.memory_space<vmem>>, vector<1x128xf32>,
      %cst_30 = arith.constant 0.000000e+00 : f32
      %35 = vector.broadcast %cst_30 : f32 to vector<1x128xf32>
      %c0_31 = arith.constant 0 : index
      %c0_32 = arith.constant 0 : index
      %36 = vector.load %arg9[%c0_31, %c0_32] : memref<1x128xf32, #tpu.memory_space<vmem>>, vector<1x128xf32>
      tpu.vector_store %arg9[%c0_31, %c0_32], %35 {strides = array<i32>} : memref<1x128xf32, #tpu.memory_space<vmem>>, vector<1x128xf32>,
    } else {
    }
    %c0_4 = arith.constant 0 : index
    %c0_5 = arith.constant 0 : index
    %5 = vector.load %arg6[%c0_4, %c0_5] : memref<1x128xf32, #tpu.memory_space<vmem>>, vector<1x128xf32>
    %6 = vector.broadcast %5 : vector<1x128xf32> to vector<16x128xf32>
    %7 = arith.subf %0, %6 : vector<16x128xf32>
    %8 = arith.subf %0, %1 : vector<16x128xf32>
    %c0_6 = arith.constant 0 : index
    %c0_7 = arith.constant 0 : index
    %9 = vector.load %arg7[%c0_6, %c0_7] : memref<1x128xf32, #tpu.memory_space<vmem>>, vector<1x128xf32>
    %cst = arith.constant dense<0.000000e+00> : vector<128xf32>
    %10 = vector.multi_reduction <add>, %7, %cst [0] : vector<16x128xf32> to vector<128xf32>
    %11 = vector.shape_cast %10 : vector<128xf32> to vector<1x128xf32>
    %12 = arith.addf %9, %11 : vector<1x128xf32>
    %c0_8 = arith.constant 0 : index
    %c0_9 = arith.constant 0 : index
    %13 = vector.load %arg7[%c0_8, %c0_9] : memref<1x128xf32, #tpu.memory_space<vmem>>, vector<1x128xf32>
    tpu.vector_store %arg7[%c0_8, %c0_9], %12 {strides = array<i32>} : memref<1x128xf32, #tpu.memory_space<vmem>>, vector<1x128xf32>,
    %c0_10 = arith.constant 0 : index
    %c0_11 = arith.constant 0 : index
    %14 = vector.load %arg8[%c0_10, %c0_11] : memref<1x128xf32, #tpu.memory_space<vmem>>, vector<1x128xf32>
    %15 = arith.mulf %7, %7 : vector<16x128xf32>
    %cst_12 = arith.constant dense<0.000000e+00> : vector<128xf32>
    %16 = vector.multi_reduction <add>, %15, %cst_12 [0] : vector<16x128xf32> to vector<128xf32>
    %17 = vector.shape_cast %16 : vector<128xf32> to vector<1x128xf32>
    %18 = arith.addf %14, %17 : vector<1x128xf32>
    %c0_13 = arith.constant 0 : index
    %c0_14 = arith.constant 0 : index
    %19 = vector.load %arg8[%c0_13, %c0_14] : memref<1x128xf32, #tpu.memory_space<vmem>>, vector<1x128xf32>
    tpu.vector_store %arg8[%c0_13, %c0_14], %18 {strides = array<i32>} : memref<1x128xf32, #tpu.memory_space<vmem>>, vector<1x128xf32>,
    %c0_15 = arith.constant 0 : index
    %c0_16 = arith.constant 0 : index
    %20 = vector.load %arg9[%c0_15, %c0_16] : memref<1x128xf32, #tpu.memory_space<vmem>>, vector<1x128xf32>
    %21 = arith.mulf %8, %8 : vector<16x128xf32>
    %cst_17 = arith.constant dense<0.000000e+00> : vector<128xf32>
    %22 = vector.multi_reduction <add>, %21, %cst_17 [0] : vector<16x128xf32> to vector<128xf32>
    %23 = vector.shape_cast %22 : vector<128xf32> to vector<1x128xf32>
    %24 = arith.addf %20, %23 : vector<1x128xf32>
    %c0_18 = arith.constant 0 : index
    %c0_19 = arith.constant 0 : index
    %25 = vector.load %arg9[%c0_18, %c0_19] : memref<1x128xf32, #tpu.memory_space<vmem>>, vector<1x128xf32>
    tpu.vector_store %arg9[%c0_18, %c0_19], %24 {strides = array<i32>} : memref<1x128xf32, #tpu.memory_space<vmem>>, vector<1x128xf32>,
    %c0_i32_20 = arith.constant 0 : i32
    %26 = arith.cmpi eq, %arg1, %c0_i32_20 : i32
    %27 = arith.extui %26 : i1 to i32
    %c0_i32_21 = arith.constant 0 : i32
    %28 = arith.cmpi ne, %27, %c0_i32_21 : i32
    scf.if %28 {
      %c0_22 = arith.constant 0 : index
      %c0_23 = arith.constant 0 : index
      %29 = vector.load %arg7[%c0_22, %c0_23] : memref<1x128xf32, #tpu.memory_space<vmem>>, vector<1x128xf32>
      %c0_24 = arith.constant 0 : index
      %c0_25 = arith.constant 0 : index
      %30 = vector.load %arg8[%c0_24, %c0_25] : memref<1x128xf32, #tpu.memory_space<vmem>>, vector<1x128xf32>
      %cst_26 = arith.constant 6.250000e-02 : f32
      %31 = vector.broadcast %cst_26 : f32 to vector<1x128xf32>
      %32 = arith.mulf %29, %31 : vector<1x128xf32>
      %33 = arith.mulf %29, %32 : vector<1x128xf32>
      %34 = arith.subf %30, %33 : vector<1x128xf32>
      %cst_27 = arith.constant 0.000000e+00 : f32
      %35 = vector.broadcast %cst_27 : f32 to vector<1x128xf32>
      %36 = arith.maximumf %34, %35 : vector<1x128xf32>
      %cst_28 = arith.constant 0.000000e+00 : f32
      %37 = vector.broadcast %cst_28 : f32 to vector<1x128xf32>
      %38 = arith.cmpf olt, %36, %37 : vector<1x128xf32>
      %cst_29 = arith.constant 0.000000e+00 : f32
      %39 = vector.broadcast %cst_29 : f32 to vector<1x128xf32>
      %40 = arith.select %38, %39, %36 : vector<1x128xi1>, vector<1x128xf32>
      %c0_30 = arith.constant 0 : index
      %c0_31 = arith.constant 0 : index
      %41 = vector.load %arg9[%c0_30, %c0_31] : memref<1x128xf32, #tpu.memory_space<vmem>>, vector<1x128xf32>
      %42 = arith.divf %41, %40 : vector<1x128xf32>
      %c0_32 = arith.constant 0 : index
      %c0_33 = arith.constant 0 : index
      %c0_34 = arith.constant 0 : index
      %43 = vector.load %arg5[%c0_32, %c0_33, %c0_34] : memref<1x1x128xf32, #tpu.memory_space<vmem>>, vector<1x1x128xf32>
      %44 = vector.shape_cast %43 : vector<1x1x128xf32> to vector<1x128xf32>
      %45 = vector.shape_cast %42 : vector<1x128xf32> to vector<1x1x128xf32>
      tpu.vector_store %arg5[%c0_32, %c0_33, %c0_34], %45 {strides = array<i32>} : memref<1x1x128xf32, #tpu.memory_space<vmem>>, vector<1x1x128xf32>,
    } else {
    }
    return
  }
  func.func @transform_0(%arg0: i32, %arg1: i32, %arg2: memref<3xi32, #tpu.memory_space<smem>>) -> (i32, i32) {
    %0 = arith.index_cast %arg0 : i32 to index
    %1 = memref.load %arg2[%0] : memref<3xi32, #tpu.memory_space<smem>>
    %c0_i32 = arith.constant 0 : i32
    return %arg1, %1 : i32, i32
  }
  func.func @transform_1(%arg0: i32, %arg1: i32, %arg2: memref<3xi32, #tpu.memory_space<smem>>) -> (i32, i32) {
    %0 = arith.index_cast %arg0 : i32 to index
    %1 = memref.load %arg2[%0] : memref<3xi32, #tpu.memory_space<smem>>
    %c0_i32 = arith.constant 0 : i32
    return %arg1, %1 : i32, i32
  }
  func.func @transform_2(%arg0: i32, %arg1: i32, %arg2: memref<3xi32, #tpu.memory_space<smem>>) -> (i32, i32, i32) {
    %c0_i32 = arith.constant 0 : i32
    %c0_i32_0 = arith.constant 0 : i32
    %c0_i32_1 = arith.constant 0 : i32
    return %arg0, %c0_i32, %c0_i32_0 : i32, i32, i32
  }
}

</mosaic_0001>

<bundles_post_ra>
// kernel: tpu_custom_call.1
= control target key start
LH: loop header
LB: loop body
LE: loop exit
PB: predicated region body
PF: predicated region fallthrough
CT: control target
= control target key end

     0   :  { %s794_s15 = smov [#allocation7]   ;;  %s1091_s0 = inlined_call_operand.hbm [shape: s32[3], index: 0, kind: input, shape index: {}]   ;;  %s1092_s1 = inlined_call_operand.hbm [shape: f32[16,768], index: 1, kind: input, shape index: {}]   ;;  %s1093_s2 = inlined_call_operand.hbm [shape: f32[16,768], index: 2, kind: input, shape index: {}]   ;;  %s1094_s3 = inlined_call_operand.hbm [shape: f32[3,1,128], index: 3, kind: output, shape index: {}]  }
   0x1   :  { %1105 = sst [smem:[#allocation29_spill]] %s1092_s1  ;;  %s9_s14 = sshll.u32 %s1091_s0, 4  ;;  %s10_s14 = int_to_ptr.hbm [resolvable:$true] %s9_s14 }
   0x2   :  { %12 = dma.hbm_to_smem %s10_s14, 16, %s794_s15, [#allocation6] }
   0x3   :  { %732 = dma.done.wait [#allocation6], 16 }
   0x4   :  { %733 = vsyncadd [#allocation6], 4294967280 }
   0x5   :  { %15 = sfence }
   0x6   :  { %16 = vsyncpa [#allocation9], 0 }
   0x7   :  { %18 = vsyncpa [#allocation9 + $0x1], 0 }
   0x8   :  { %19 = vsyncpa [#allocation12], 0 }
   0x9   :  { %21 = vsyncpa [#allocation12 + $0x1], 0 }
   0xa   :  { %22 = vsyncpa [#allocation10], 0 }
   0xb   :  { %24 = vsyncpa [#allocation10 + $0x1], 0  ;;  %s822_s16 = smov 0   ;;  %s824_s17 = smov 0  }
   0xc   :  { %s826_s18 = smov 0   ;;  %s828_s19 = smov 0  }
   0xd   :  { %s830_s0 = smov 0   ;;  %s832_s20 = smov 0  }
   0xe   :  { %s834_s21 = smov 0   ;;  %s836_s22 = smov 0  }
   0xf   :  { %s838_s23 = smov 0   ;;  %s840_s24 = smov 0  }
  0x10   :  { %s842_s25 = smov 0   ;;  %s844_s26 = smov 0  }
  0x11 LB: > { %1106 = sst [smem:[#allocation22_spill]] %s748_s16  ;;  %s440_s27 = sadd.s32 4294967295, %s792_s26   ;;  %s792_s26 = sphi %s844_s26, %s30_s26   ;;  %s788_s25 = sphi %s842_s25, %s1146_s25   ;;  %s784_s24 = sphi %s840_s24, %s1145_s24   ;;  %s780_s23 = sphi %s838_s23, %s1137_s23   ;;  %s776_s22 = sphi %s836_s22, %s1144_s22   ;;  %s772_s21 = sphi %s834_s21, %s1143_s21   ;;  %s768_s20 = sphi %s832_s20, %s1142_s20   ;;  %s764_s0 = sphi %s830_s0, %s1141_s0   ;;  %s760_s19 = sphi %s828_s19, %s1140_s19   ;;  %s756_s18 = sphi %s826_s18, %s1135_s18   ;;  %s752_s17 = sphi %s824_s17, %s1139_s17   ;;  %s748_s16 = sphi %s822_s16, %s1138_s16  }
  0x12   : > { %1107 = sst [smem:[#allocation23_spill]] %s756_s18  ;;  %s441_s28 = sadd.s32 4294967294, %s792_s26  }
  0x13   : > { %1108 = sst [smem:[#allocation24_spill]] %s780_s23  ;;  %s42_s29 = sadd.s32 1, %s788_s25 }
  0x14   : > { %s46_s30 = sld [smem:[#allocation7 + %s788_s25]]  ;;  %p44_p0 = scmp.ge.s32.totalorder %s42_s29, 3 }
  0x15   : > { %s53_s4 = sadd.s32 1, %s780_s23  ;;  %p60_p1 = scmp.ne.s32.totalorder %s780_s23, %s776_s22 }
  0x16   : > { %p1101_p2 = scmp.eq.s32.totalorder %s792_s26, 0  ;;  %s1148_s29 = smov (%p44_p0, %s42_s29), 0 }
  0x17   : > { %p66_p4 = scmp.ne.s32.totalorder %s776_s22, %s772_s21  ;;  %s47_s6 = sld [smem:[#allocation7 + %s1148_s29]] }
  0x18   : > { %p892_p3 = por %p1101_p2, %p60_p1  ;;  %p898_p5 = scmp.eq.s32.totalorder %s440_s27, 0 }
  0x19   : > { %s106_s8 = ssub.s32 %s788_s25, %s1148_s29  ;;  %s109_s9 = sadd.s32 1, %s756_s18 }
  0x1a   : > { %p907_p6 = por %p898_p5, %p66_p4  ;;  %p107_p7 = scmp.eq.s32.totalorder %s106_s8, 0 }
  0x1b   : > { %p119_p8 = scmp.ne.s32.totalorder %s756_s18, %s752_s17  ;;  %p120_p9 = scmp.eq.s32.totalorder %s440_s27, 2 }
  0x1c   : > { %s914_s11 = scalar_select %p107_p7, %s756_s18, %s109_s9  }
  0x1d   : > { %p916_p10 = por %p120_p9, %p119_p8  ;;  %p125_p11 = scmp.ne.s32.totalorder %s752_s17, %s748_s16 }
  0x1e   : > { %1112 = sst [smem:[#allocation25_spill]] %s914_s11  ;;  %s49_s13 = ssub.s32 %s46_s30, %s47_s6 }
  0x1f   : > { %p126_p12 = scmp.eq.s32.totalorder %s441_s28, 2  ;;  %p51_p13 = scmp.eq.s32.totalorder %s49_s13, 0 }
  0x20   : > { %p1100_p1 = scmp.lt.s32.totalorder %s792_s26, 3  ;;  %s146_s21 = sand.u32 1, %s780_s23  }
  0x21   : > { %p922_p0 = por %p126_p12, %p125_p11  ;;  %s444_s30 = sshll.u32 %s146_s21, 4 }
  0x22   : > { %s928_s15 = scalar_select %p51_p13, %s780_s23, %s53_s4  }
  0x23   : > { %s1114_s14 = scalar_select %p922_p0, 1, 0 }
  0x24   : > { %1116 = sst [smem:[#allocation27_spill]] %s928_s15  ;;  %p935_p4 = pnand %p1100_p1, %p892_p3 }
  0x25   : > { %1115 = sst [smem:[#allocation26_spill]] %s1114_s14  ;;  %s150_s4 = scalar_lea.vmem [#allocation8], %s444_s30 }
  0x26   : > { %s453_s28 = scalar_select %p892_p3, [#allocation7], [#allocation14] }
  0x27   : > { %s454_s6 = scalar_select %p892_p3, %s788_s25, 0 }
  0x28   : > { %s1150_s28 = smov (!%p1100_p1, %s453_s28), [#allocation16]  ;;  %s948_s8 = sshll.u32 %s150_s4, 4 }
  0x29   : > { %s1152_s6 = smov (!%p1100_p1, %s454_s6), 0  ;;  %1118 = sst [smem:[#allocation28_spill]] %s948_s8 }
  0x2a   : > { %s151_s9 = sld [smem:[%s1150_s28 + %s1152_s6]]  ;;  %p448_p7 = scmp.ge.s32.totalorder %s792_s26, 1 }
  0x2b   : > { %p194_p8 = scmp.lt.s32.totalorder %s792_s26, 4  ;;  %s1120_s1 = sld [smem:[#allocation29_spill]] }
  0x2c   : > { %s961_s18 = sld [smem:[#allocation7 + %s788_s25]]  ;;  %s147_s14 = scalar_lea.sflag [#allocation9], %s146_s21 }
  0x2d   : > { %p953_p9 = pnand %p448_p7, %p194_p8  ;;  %s77_s4 = sld [smem:[#allocation7 + %s1148_s29]] }
  0x2e   : > { %p600_p11 = pneg %p935_p4 }
  0x30   : > { %s445_s15 = sshll.u32 %s151_s9, 3 }
  0x31   : > { %s158_s11 = scalar_lea.hbm %s1120_s1, %s445_s15  ;;  %s603_s16 = scalar_lea.hbm %s1120_s1, 96 }
  0x32   : > { %s159_s30 = sshll.u32 %s158_s11, 4  ;;  %s160_s30 = int_to_ptr.hbm [resolvable:$true] %s159_s30 }
  0x33   : > { %s596_s28 = sshra.s32 %s160_s30, 4  ;;  %s597_s28 = int_to_ptr.hbm [resolvable:$true] %s596_s28 }
  0x34   : > { %s598_s6 = scalar_lea.hbm %s597_s28, 16  ;;  %p604_p7 = scmp.lt.s32.totalorder %s597_s28, %s1120_s1 }
  0x35   : > { %p599_p3 = scmp.ne.s32.totalorder %s597_s28, %s598_s6  ;;  %p605_p8 = scmp.lt.s32.totalorder %s603_s16, %s598_s6 }
  0x37   : > { %p601_p12 = pnand %p600_p11, %p599_p3  ;;  %p606_p1 = por %p605_p8, %p604_p7 }
  0x39   : > { %p602_p13 = pneg %p601_p12 }
  0x3b   : > { %p607_p2 = pnand %p606_p1, %p602_p13 }
  0x3d   : > { %610 = shalt.err (!%p607_p2)
}
  0x3e   : > { %s1102_s11 = smov 768   ;;  %s1121_s21 = sld [smem:[#allocation28_spill]] }
  0x3f   : > { %s1103_s8 = smov 128   ;;  %s1104_s16 = smov 8  }
  0x40   : > { %p90_p2 = scmp.ne.s32.totalorder %s768_s20, %s764_s0  ;;  %p96_p1 = scmp.ne.s32.totalorder %s764_s0, %s760_s19 }
  0x41   : > { %s83_s28 = sadd.s32 1, %s768_s20  ;;  %s171_s9 = sand.u32 1, %s768_s20  }
  0x42   : > { %p986_p3 = por %p96_p1, %p898_p5  ;;  %s79_s23 = ssub.s32 %s961_s18, %s77_s4 }
  0x43   : > { %p1124_p11 = scmp.eq.s32.totalorder %s792_s26, 0  ;;  %p81_p13 = scmp.eq.s32.totalorder %s79_s23, 0 }
  0x44   : > { %s1122_s5 = int_to_ptr.vmem [resolvable:$true] %s1121_s21  ;;  %s446_s27 = sshll.u32 %s171_s9, 4 }
  0x45   : > { %468 = dma.hbm_to_vmem [thread:$0]  (!%p935_p4), %s160_s30, 256, %s1122_s5, %s147_s14, %s1102_s11, %s1103_s8, %s1104_s16  }
  0x46   : > { %p92_p12 = por %p90_p2, %p1124_p11  ;;  %p1125_p7 = scmp.lt.s32.totalorder %s792_s26, 3 }
  0x47   : > { %s1001_s14 = scalar_select %p81_p13, %s768_s20, %s83_s28  }
  0x48   : > { %p996_p8 = pnand %p1125_p7, %p92_p12  ;;  %p1127_p4 = pmov %p1125_p7 }
  0x49   : > { %s456_s19 = scalar_select %p92_p12, [#allocation7], [#allocation15] }
  0x4a   : > { %s457_s30 = scalar_select %p92_p12, %s788_s25, 0 }
  0x4b   : > { %s1154_s19 = smov (!%p1127_p4, %s456_s19), [#allocation17]  ;;  %p1128_p5 = pmov %p1127_p4 }
  0x4c   : > { %s175_s18 = scalar_lea.vmem [#allocation11], %s446_s27  ;;  %s172_s28 = scalar_lea.sflag [#allocation12], %s171_s9 }
  0x4d   : > { %s1156_s30 = smov (!%p1128_p5, %s457_s30), 0  ;;  %s186_s4 = sshll.u32 %s175_s18, 4  ;;  %s187_s4 = int_to_ptr.vmem [resolvable:$true] %s186_s4 }
  0x4e   : > { %s176_s7 = sld [smem:[%s1154_s19 + %s1156_s30]]  ;;  %p630_p1 = pneg %p996_p8 }
  0x4f   : > { %s633_s30 = scalar_lea.hbm %s1093_s2, 96 }
  0x54   : > { %s447_s21 = sshll.u32 %s176_s7, 3 }
  0x55   : > { %s183_s11 = scalar_lea.hbm %s1093_s2, %s447_s21 }
  0x56   : > { %s184_s8 = sshll.u32 %s183_s11, 4  ;;  %s185_s8 = int_to_ptr.hbm [resolvable:$true] %s184_s8 }
  0x57   : > { %s626_s16 = sshra.s32 %s185_s8, 4  ;;  %s627_s16 = int_to_ptr.hbm [resolvable:$true] %s626_s16 }
  0x58   : > { %s628_s1 = scalar_lea.hbm %s627_s16, 16  ;;  %p634_p13 = scmp.lt.s32.totalorder %s627_s16, %s1093_s2 }
  0x59   : > { %p629_p2 = scmp.ne.s32.totalorder %s627_s16, %s628_s1  ;;  %p635_p7 = scmp.lt.s32.totalorder %s633_s30, %s628_s1 }
  0x5b   : > { %p631_p11 = pnand %p630_p1, %p629_p2  ;;  %p636_p4 = por %p635_p7, %p634_p13 }
  0x5d   : > { %p632_p12 = pneg %p631_p11 }
  0x5f   : > { %p637_p5 = pnand %p636_p4, %p632_p12 }
  0x61   : > { %640 = shalt.err (!%p637_p5)
}
  0x62   : > { %s1129_s11 = smov 8   ;;  %s1130_s9 = smov 128  }
  0x63   : > { %s1131_s21 = smov 768   ;;  %198 = sbr.rel (%p953_p9) target bundleno = 179 (0xb3), region = 28 }
  0x64   : > { %473 = dma.hbm_to_vmem [thread:$0]  (!%p996_p8), %s185_s8, 256, %s187_s4, %s172_s28, %s1131_s21, %s1130_s9, %s1129_s11  }
  0x65   : > { %s200_s5 = sand.u32 (!%p953_p9), 1, %s776_s22  }
  0x66   : > { %s449_s23 = sshll.u32 (!%p953_p9), %s200_s5, 4  ;;  %s201_s19 = scalar_lea.sflag (!%p953_p9), [#allocation9], %s200_s5 }
  0x67   : > { %s204_s27 = scalar_lea.vmem (!%p953_p9), [#allocation8], %s449_s23 }
  0x68   : > { %735 = dma.done.wait (%p907_p6), %s201_s19, 256  }
  0x69   : > { %737 = vsyncadd (%p907_p6), %s201_s19, 4294967040  ;;  %s210_s1 = sand.u32 1, %s764_s0  }
  0x6a   : > { %s450_s16 = sshll.u32 %s210_s1, 4  ;;  %s211_s15 = scalar_lea.sflag [#allocation12], %s210_s1 }
  0x6b   : > { %s214_s8 = scalar_lea.vmem [#allocation11], %s450_s16 }
  0x6c   : > { %739 = dma.done.wait (%p986_p3), %s211_s15, 256  }
  0x6d   : > { %741 = vsyncadd (%p986_p3), %s211_s15, 4294967040  ;;  %v798_v0 = vmov 0.0   ;;  %v244_v1 = vld [vmem:[%s204_s27] sm:$0xff]  ;;  %v245_v3 = vld [vmem:[%s204_s27 + $0x8] sm:$0xff]  ;;  %s238_s10 = sand.u32 1, %s752_s17   ;;  %s335_s4 = scalar_lea.hbm %s1094_s3, %s784_s24 }
  0x6e   : > { %253 = vst [vmem:[#allocation3] sm:$0x1] %v798_v0  ;;  %v246_v2 = vld [vmem:[%s214_s8] sm:$0xff]  ;;  %v247_v4 = vld [vmem:[%s214_s8 + $0x8] sm:$0xff]  ;;  %s239_s28 = scalar_lea.vmem [#allocation13], %s238_s10  ;;  %s339_s7 = sshll.u32 %s335_s4, 4  ;;  %s340_s7 = int_to_ptr.hbm [resolvable:$true] %s339_s7 }
  0x6f   : > { %254 = vst [vmem:[#allocation4] sm:$0x1] %v798_v0  ;;  %v262_v5 = vsub.f32 %v244_v1, %v246_v2  ;;  %v263_v6 = vsub.f32 %v245_v3, %v247_v4  ;;  %s337_s30 = sshll.u32 %s239_s28, 4  ;;  %s327_s18 = scalar_lea.sflag [#allocation10], %s238_s10  ;;  %s338_s30 = int_to_ptr.vmem [resolvable:$true] %s337_s30 }
  0x70   : > { %255 = vst [vmem:[#allocation5] sm:$0x1] %v798_v0  ;;  %s670_s11 = sshra.s32 %s340_s7, 4  ;;  %s676_s5 = scalar_lea.hbm %s1094_s3, 3  ;;  %s671_s11 = int_to_ptr.hbm [resolvable:$true] %s670_s11 }
  0x71   : > { %252 = vst [vmem:[#allocation2] sm:$0x1] %v244_v1  ;;  %v287_v7 = vmul.f32 %v262_v5, %v262_v5  ;;  %v288_v8 = vmul.f32 %v263_v6, %v263_v6  ;;  %s672_s24 = scalar_lea.hbm %s671_s11, 1  ;;  %p677_p8 = scmp.lt.s32.totalorder %s671_s11, %s1094_s3 }
  0x72   : > { %p673_p6 = scmp.ne.s32.totalorder %s671_s11, %s672_s24  ;;  %p678_p2 = scmp.lt.s32.totalorder %s676_s5, %s672_s24 }
  0x73   : > { %v289_v9 = vadd.f32 %v288_v8, %v287_v7 }
  0x74   : > { %p674_p9 = pnand %p673_p6, %p916_p10  ;;  %p679_p1 = por %p678_p2, %p677_p8 }
  0x75   : > { %v290_v11 = vrot.slane %v289_v9, 4  ;;  %v264_v34 = vld [vmem:[#allocation3] sm:$0x1] }
  0x76   : > { %v274_v37 = vld [vmem:[#allocation4] sm:$0x1]  ;;  %p675_p3 = pneg %p674_p9 }
  0x77   : > { %v291_v14 = vadd.f32 %v290_v11, %v289_v9  ;;  %v286_v25 = vld [vmem:[#allocation5] sm:$0x1] }
  0x78   : > { %v581_v10 = vld [vmem:[#allocation2] ss:$0 sm:$0xff]  ;;  %p680_p11 = pnand %p679_p1, %p675_p3 }
  0x79   : > { %v260_v12 = vsub.f32 %v244_v1, %v581_v10  ;;  %v261_v13 = vsub.f32 %v245_v3, %v581_v10  ;;  %v292_v18 = vrot.slane %v291_v14, 2 }
  0x7b   : > { %v265_v15 = vadd.f32 %v261_v13, %v260_v12  ;;  %v275_v16 = vmul.f32 %v260_v12, %v260_v12  ;;  %v276_v17 = vmul.f32 %v261_v13, %v261_v13  ;;  %v293_v21 = vadd.f32 %v292_v18, %v291_v14 }
  0x7d   : > { %v266_v19 = vrot.slane %v265_v15, 4  ;;  %v277_v20 = vadd.f32 %v276_v17, %v275_v16  ;;  %v294_v24 = vrot.slane %v293_v21, 1 }
  0x7f   : > { %v267_v22 = vadd.f32 %v266_v19, %v265_v15  ;;  %v278_v23 = vrot.slane %v277_v20, 4  ;;  %v295_v28 = vadd.f32 %v294_v24, %v293_v21 }
  0x81   : > { %v268_v26 = vrot.slane %v267_v22, 2  ;;  %v279_v27 = vadd.f32 %v278_v23, %v277_v20  ;;  %v296_v31 = vadd.f32 %v295_v28, %v286_v25 }
  0x83   : > { %v269_v29 = vadd.f32 %v268_v26, %v267_v22  ;;  %v280_v30 = vrot.slane %v279_v27, 2  ;;  %297 = vst [vmem:[#allocation5] sm:$0x1] %v296_v31 }
  0x85   : > { %v270_v32 = vrot.slane %v269_v29, 1  ;;  %v281_v33 = vadd.f32 %v280_v30, %v279_v27 }
  0x87   : > { %v271_v35 = vadd.f32 %v270_v32, %v269_v29  ;;  %v282_v36 = vrot.slane %v281_v33, 1 }
  0x89   : > { %v272_v38 = vadd.f32 %v271_v35, %v264_v34  ;;  %v283_v39 = vadd.f32 %v282_v36, %v281_v33 }
  0x8a   : > { %v309_v55 = vld [vmem:[#allocation5] sm:$0x1] }
  0x8b   : > { %273 = vst [vmem:[#allocation3] sm:$0x1] %v272_v38  ;;  %v284_v40 = vadd.f32 %v283_v39, %v274_v37 }
  0x8d   : > { %285 = vst [vmem:[#allocation4] sm:$0x1] %v284_v40 }
  0x92   : > { %v301_v41 = vld [vmem:[#allocation3] sm:$0x1] }
  0x93   : > { %v303_v42 = vmul.f32 0.0625, %v301_v41 }
  0x94   : > { %v302_v44 = vld [vmem:[#allocation4] sm:$0x1] }
  0x95   : > { %v304_v43 = vmul.f32 %v303_v42, %v301_v41 }
  0x97   : > { %v305_v45 = vsub.f32 %v302_v44, %v304_v43 }
  0x99   : > { %v306_v46 = vmax.f32 %v305_v45, 0.0 }
  0x9b   : > { %vm307_vm0 = vcmp.lt.f32.partialorder %v306_v46, 0.0 }
  0x9c   : > { %v308_v47 = vsel %vm307_vm0, 0.0, %v306_v46 }
  0x9d   : > { %582 = vrcp.f32 %v308_v47  ;;  %v321_v51 = vand.u32 2147483648, %v308_v47  ;;  %v319_v53 = vand.u32 2147483647, %v308_v47  ;;  %vm315_vm2 = vweird.f32 %v308_v47 }
  0x9f   : > { %v322_v56 = vor.u32 1.1754944e-38, %v321_v51  ;;  %vm320_vm4 = vcmp.eq.f32.partialorder %v319_v53, 8.507059e+37 }
  0xa3   : > { %v583_v48 = vpop.eup %582 }
  0xa4   : > { %v311_v49 = vmul.f32 %v583_v48, %v308_v47  ;;  %vm316_vm1 = vweird.f32 %v583_v48 }
  0xa5   : > { %vm317_vm3 = vmor %vm315_vm2, %vm316_vm1 }
  0xa6   : > { %v312_v50 = vsub.f32 1.0, %v311_v49 }
  0xa8   : > { %v313_v52 = vmul.f32 %v583_v48, %v312_v50 }
  0xaa   : > { %v314_v54 = vadd.f32 %v583_v48, %v313_v52 }
  0xac   : > { %v318_v57 = vsel %vm317_vm3, %v583_v48, %v314_v54 }
  0xad   : > { %v323_v58 = vsel %vm320_vm4, %v322_v56, %v318_v57 }
  0xae   : > { %v324_v59 = vmul.f32 %v323_v58, %v309_v55 }
  0xb0   : > { %325 = vst [vmem:[%s239_s28] sm:$0x1] %v324_v59 }
  0xb1   : > { %683 = shalt.err (!%p680_p11)
}
  0xb2   : > { %461 = dma.vmem_to_hbm [thread:$0]  (%p916_p10), %s338_s30, 16, %s340_s7, %s327_s18  }
  0xb3 PF: > { %s1132_s27 = sld [smem:[#allocation22_spill]]  ;;  %p479_p12 = scmp.ge.s32.totalorder %s792_s26, 2 }
  0xb5   : > { %p475_p13 = pnand %p479_p12, %p922_p0 }
  0xb7   : > { %p476_p7 = pneg %p475_p13 }
  0xb9   : > { %s351_s16 = sand.u32 1, %s1132_s27  }
  0xba   : > { %s352_s15 = scalar_lea.sflag [#allocation10], %s351_s16 }
  0xbb   : > { %743 = dma.done.wait (%p476_p7), %s352_s15, 16  }
  0xbc   : > { %745 = vsyncadd (%p476_p7), %s352_s15, 4294967280  ;;  %s30_s26 = sadd.s32 1, %s792_s26   ;;  %s1134_s8 = sld [smem:[#allocation23_spill]] }
  0xbd   : > { %p27_p4 = scmp.ge.s32.totalorder %s30_s26, 5   ;;  %s1135_s18 = sld [smem:[#allocation25_spill]] }
  0xbe   : > { %s1136_s12 = sld [smem:[#allocation24_spill]]  ;;  %s1138_s16 = smov %s752_s17 }
  0xbf   : > { %s1137_s23 = sld [smem:[#allocation27_spill]]  ;;  %s1140_s19 = smov %s764_s0 }
  0xc0   : > { %s1141_s0 = smov %s768_s20  ;;  %s1142_s20 = smov %s1001_s14 }
  0xc1   : > { %s1143_s21 = smov %s776_s22  ;;  %s1145_s24 = smov %s788_s25 }
  0xc2   : > { %s1139_s17 = smov %s1134_s8  ;;  %s1146_s25 = smov %s1148_s29 }
  0xc3   :  { %29 = sbr.rel (!%p27_p4) target bundleno = 17 (0x11), region = 94 }
  0xc4   : > { %s1144_s22 = smov %s1136_s12 }
  0xc8   :  { %357 = vsyncpa [#allocation9], 1 }
  0xc9   :  { %359 = vsyncpa [#allocation9 + $0x1], 1 }
  0xca   :  { %360 = vsyncpa [#allocation12], 1 }
  0xcb   :  { %362 = vsyncpa [#allocation12 + $0x1], 1 }
  0xcc   :  { %363 = vsyncpa [#allocation10], 1 }
  0xcd   :  { %365 = vsyncpa [#allocation10 + $0x1], 1 }

</bundles_post_ra>
